<compile_context>
chip_gen: v7x
topology: tpu7x:2x2x1
jax: 0.10.0
libtpu: 0.0.40
codegen_flags: <defaults>
</compile_context>

<pallas_src>
import dataclasses
import functools

import jax
import jax.numpy as jnp
from jax.experimental import pallas as pl
from jax.experimental.pallas import tpu as pltpu


@dataclasses.dataclass(frozen=True)
class Config:
    r_min: float = 0.5
    r_max: float = 2.0
    radius_rate: float = 0.1


def _radius_adjust_kernel(states_ref, attn_ref, out_ref, *, r_min, r_max, rate):
    # states_ref: (1, 2, TN), attn_ref: (1, TN, N), out_ref: (1, 2, TN)
    s = states_ref[...].astype(jnp.float32)                        # (1, 2, TN)

    # Row-sum of the attention slab with the cast fused into the accumulation
    # (avoids materializing an f32 copy of the whole tile for bf16/fp8 inputs).
    attn_sum = jnp.sum(attn_ref[...], axis=2, dtype=jnp.float32)   # (1, TN)
    attn_sum = attn_sum[:, None, :]                                # (1, 1, TN)

    # Per-token radius over the coordinate dim (size 2 -> cheap sublane sum).
    radii = jnp.sqrt(jnp.sum(s * s, axis=1, keepdims=True))        # (1, 1, TN)

    new_radii = jnp.clip(radii + attn_sum * rate, r_min, r_max)
    scale = new_radii / (radii + 1e-8)   # same clip order / epsilon as reference

    out_ref[...] = (s * scale).astype(out_ref.dtype)


def _round_up(x, m):
    return ((x + m - 1) // m) * m


def _sublane_multiple(dtype):
    # 32-bit dtypes: 8 sublanes per vreg; bf16 packs 16; 8-bit packs 32.
    return 8 * max(1, 4 // dtype.itemsize)


def _vmem_capacity_bytes():
    try:
        return int(pltpu.get_tpu_info().vmem_capacity_bytes)
    except Exception:
        return 64 * 1024 * 1024  # conservative (v7x-sized) fallback


def _choose_row_tile(n, attn_itemsize, per_buffer_budget):
    """Largest TN (multiple of 128) whose (TN, N) attention slab fits the
    per-buffer budget; cdiv + Pallas masking handle any ragged last tile."""
    n_pad = _round_up(n, 128)
    max_rows = per_buffer_budget // max(1, n_pad * attn_itemsize)
    tn = (max_rows // 128) * 128
    if tn <= 0:
        tn = 128  # pathologically large N: still correct, just a bigger slab
    if tn >= n:
        return n  # whole row dim fits a single full-extent block
    return tn


def radius_adjustment(states, attention, config: Config):
    """states: [B, N, 2], attention: [B, N, N] -> [B, N, 2]."""
    B, N, two = states.shape
    assert two == 2
    assert attention.shape == (B, N, N)

    attn_bytes = attention.dtype.itemsize
    state_bytes = states.dtype.itemsize

    vmem_cap = _vmem_capacity_bytes()
    # Generation-aware per-attention-buffer budget: larger slabs on v5e/v6e
    # (128 MiB VMEM), smaller on v7x (64 MiB per TensorCore).
    if vmem_cap >= 96 * 1024 * 1024:
        per_buffer_budget = 24 * 1024 * 1024
    else:
        per_buffer_budget = 12 * 1024 * 1024

    TN = _choose_row_tile(N, attn_bytes, per_buffer_budget)
    num_row_tiles = -(-N // TN)

    # Guarantee >= 2 parallel grid steps so v7x's two TensorCores both stream
    # attention when B == 1 and N fits a single tile.
    if B == 1 and num_row_tiles == 1 and N >= 256:
        TN = _round_up(-(-N // 2), 128)
        num_row_tiles = -(-N // TN)

    kernel = functools.partial(
        _radius_adjust_kernel,
        r_min=float(config.r_min),
        r_max=float(config.r_max),
        rate=float(config.radius_rate),
    )

    # VMEM budget from the *padded* block shapes (BlockSpec double-buffers).
    n_pad = _round_up(N, 128)
    attn_block = (_round_up(TN, _sublane_multiple(attention.dtype))
                  * n_pad * attn_bytes)
    state_block = (_sublane_multiple(states.dtype)
                   * _round_up(TN, 128) * state_bytes)
    working_set = 2 * attn_block + 4 * state_block   # attention + (states, out)
    vmem_limit = max(32 * 1024 * 1024, int(1.35 * working_set))
    vmem_limit = min(vmem_limit,
                     max(32 * 1024 * 1024, vmem_cap - 8 * 1024 * 1024))

    cost = pl.CostEstimate(
        flops=int(B * N * (N + 10)),          # row-sums + per-token scalar work
        transcendentals=int(B * N),           # sqrt per token
        bytes_accessed=int(B * N * N * attn_bytes + 2 * B * N * 2 * state_bytes),
    )

    # Lane-dense layout: tokens on the lane axis for states / output.
    states_t = jnp.transpose(states, (0, 2, 1))       # (B, 2, N)

    out_t = pl.pallas_call(
        kernel,
        out_shape=jax.ShapeDtypeStruct((B, 2, N), states.dtype),
        grid_spec=pltpu.PrefetchScalarGridSpec(
            num_scalar_prefetch=0,
            grid=(B, num_row_tiles),
            in_specs=[
                pl.BlockSpec((1, 2, TN), lambda b, t: (b, 0, t)),
                pl.BlockSpec((1, TN, N), lambda b, t: (b, t, 0)),
            ],
            out_specs=pl.BlockSpec((1, 2, TN), lambda b, t: (b, 0, t)),
        ),
        compiler_params=pltpu.CompilerParams(
            dimension_semantics=("parallel", "parallel"),
            vmem_limit_bytes=vmem_limit,
        ),
        cost_estimate=cost,
    )(states_t, attention)

    return jnp.transpose(out_t, (0, 2, 1))            # back to (B, N, 2)


def radius_adjustment_ref(states, attention, config: Config):
    """Pure-JAX reference matching the PyTorch forward."""
    radii = jnp.linalg.norm(states, axis=2, keepdims=True)
    attention_sum = jnp.sum(attention, axis=2, keepdims=True)
    delta_r = attention_sum * config.radius_rate
    new_radii = jnp.clip(radii + delta_r, config.r_min, config.r_max)
    scale_factor = new_radii / (radii + 1e-8)
    return states * scale_factor


if __name__ == "__main__":
    config = Config(r_min=0.5, r_max=2.0, radius_rate=0.1)
    key = jax.random.PRNGKey(0)

    for (B, N) in [(2, 8), (1, 16)]:
        key, k1, k2 = jax.random.split(key, 3)
        states = jax.random.normal(k1, (B, N, 2), dtype=jnp.float32)
        attention = jax.nn.softmax(
            jax.random.normal(k2, (B, N, N), dtype=jnp.float32), axis=-1)

        out = jax.block_until_ready(radius_adjustment(states, attention, config))
        ref = radius_adjustment_ref(states, attention, config)

        assert out.shape == (B, N, 2)
        assert jnp.allclose(out, ref, atol=1e-5, rtol=1e-5), \
            f"mismatch vs reference at B={B}, N={N}"

    print("KERNEL_OK")
</pallas_src>

<mosaic_0001>
module attributes {stable_mosaic.version = 11 : i64} {
  func.func @_radius_adjust_kernel(%arg0: i32, %arg1: i32, %arg2: memref<1x2x8xf32, #tpu.memory_space<vmem>>, %arg3: memref<1x8x8xf32, #tpu.memory_space<vmem>>, %arg4: memref<1x2x8xf32, #tpu.memory_space<vmem>>) attributes {dimension_semantics = [#tpu.dimension_semantics<parallel>, #tpu.dimension_semantics<parallel>], iteration_bounds = array<i64: 2, 1>, scalar_prefetch = 0 : i64, scratch_operands = 0 : i64, tpu.core_type = #tpu.core_type<tc>, window_params = [{transform_indices = @transform_0, window_bounds = array<i64: 1, 2, 8>}, {transform_indices = @transform_1, window_bounds = array<i64: 1, 8, 8>}, {transform_indices = @transform_2, window_bounds = array<i64: 1, 2, 8>}]} {
    %c0 = arith.constant 0 : index
    %c0_0 = arith.constant 0 : index
    %c0_1 = arith.constant 0 : index
    %0 = vector.load %arg2[%c0, %c0_0, %c0_1] : memref<1x2x8xf32, #tpu.memory_space<vmem>>, vector<1x2x8xf32>
    %c0_2 = arith.constant 0 : index
    %c0_3 = arith.constant 0 : index
    %c0_4 = arith.constant 0 : index
    %1 = vector.load %arg3[%c0_2, %c0_3, %c0_4] : memref<1x8x8xf32, #tpu.memory_space<vmem>>, vector<1x8x8xf32>
    %cst = arith.constant dense<0.000000e+00> : vector<1x8xf32>
    %2 = vector.multi_reduction <add>, %1, %cst [2] : vector<1x8x8xf32> to vector<1x8xf32>
    %3 = vector.shape_cast %2 : vector<1x8xf32> to vector<1x1x8xf32>
    %4 = arith.mulf %0, %0 : vector<1x2x8xf32>
    %cst_5 = arith.constant dense<0.000000e+00> : vector<1x8xf32>
    %5 = vector.multi_reduction <add>, %4, %cst_5 [1] : vector<1x2x8xf32> to vector<1x8xf32>
    %6 = vector.shape_cast %5 : vector<1x8xf32> to vector<1x1x8xf32>
    %7 = math.sqrt %6 : vector<1x1x8xf32>
    %cst_6 = arith.constant 1.000000e-01 : f32
    %8 = vector.broadcast %cst_6 : f32 to vector<1x1x8xf32>
    %9 = arith.mulf %3, %8 : vector<1x1x8xf32>
    %10 = arith.addf %7, %9 : vector<1x1x8xf32>
    %cst_7 = arith.constant 5.000000e-01 : f32
    %cst_8 = arith.constant 2.000000e+00 : f32
    %11 = vector.broadcast %cst_7 : f32 to vector<1x1x8xf32>
    %12 = arith.maximumf %11, %10 : vector<1x1x8xf32>
    %13 = vector.broadcast %cst_8 : f32 to vector<1x1x8xf32>
    %14 = arith.minimumf %13, %12 : vector<1x1x8xf32>
    %cst_9 = arith.constant 9.99999993E-9 : f32
    %15 = vector.broadcast %cst_9 : f32 to vector<1x1x8xf32>
    %16 = arith.addf %7, %15 : vector<1x1x8xf32>
    %17 = arith.divf %14, %16 : vector<1x1x8xf32>
    %18 = vector.broadcast %17 : vector<1x1x8xf32> to vector<1x2x8xf32>
    %19 = arith.mulf %0, %18 : vector<1x2x8xf32>
    %c0_10 = arith.constant 0 : index
    %c0_11 = arith.constant 0 : index
    %c0_12 = arith.constant 0 : index
    %20 = vector.load %arg4[%c0_10, %c0_11, %c0_12] : memref<1x2x8xf32, #tpu.memory_space<vmem>>, vector<1x2x8xf32>
    tpu.vector_store %arg4[%c0_10, %c0_11, %c0_12], %19 {strides = array<i32>} : memref<1x2x8xf32, #tpu.memory_space<vmem>>, vector<1x2x8xf32>,
    return
  }
  func.func @transform_0(%arg0: i32, %arg1: i32) -> (i32, i32, i32) {
    %c0_i32 = arith.constant 0 : i32
    %c0_i32_0 = arith.constant 0 : i32
    return %arg0, %c0_i32, %arg1 : i32, i32, i32
  }
  func.func @transform_1(%arg0: i32, %arg1: i32) -> (i32, i32, i32) {
    %c0_i32 = arith.constant 0 : i32
    %c0_i32_0 = arith.constant 0 : i32
    return %arg0, %arg1, %c0_i32 : i32, i32, i32
  }
  func.func @transform_2(%arg0: i32, %arg1: i32) -> (i32, i32, i32) {
    %c0_i32 = arith.constant 0 : i32
    %c0_i32_0 = arith.constant 0 : i32
    return %arg0, %c0_i32, %arg1 : i32, i32, i32
  }
}

</mosaic_0001>

<bundles_post_ra>
// kernel: tpu_custom_call.1
= control target key start
LH: loop header
LB: loop body
LE: loop exit
PB: predicated region body
PF: predicated region fallthrough
CT: control target
= control target key end

     0   :  { %7 = vsyncpa [#allocation3], 0  ;;  %s852_s0 = inlined_call_operand.hbm [shape: f32[2,2,8], index: 0, kind: input, shape index: {}]   ;;  %s853_s1 = inlined_call_operand.hbm [shape: f32[2,8,8], index: 1, kind: input, shape index: {}]   ;;  %s854_s2 = inlined_call_operand.hbm [shape: f32[2,2,8], index: 2, kind: output, shape index: {}]  }
   0x1   :  { %9 = vsyncpa [#allocation3 + $0x1], 0 }
   0x2   :  { %10 = vsyncpa [#allocation6], 0 }
   0x3   :  { %12 = vsyncpa [#allocation6 + $0x1], 0 }
   0x4   :  { %13 = vsyncpa [#allocation4], 0 }
   0x5   :  { %15 = vsyncpa [#allocation4 + $0x1], 0  ;;  %s631_s9 = smov 0   ;;  %s633_s10 = smov 0  }
   0x6   :  { %s635_s11 = smov 0   ;;  %s637_s12 = smov 0  }
   0x7   :  { %s639_s13 = smov 0   ;;  %s641_s14 = smov 0  }
   0x8 LB: > { %s378_s15 = sadd.s32 4294967295, %s611_s14   ;;  %s379_s16 = sadd.s32 4294967294, %s611_s14   ;;  %s611_s14 = sphi %s641_s14, %s21_s14   ;;  %s607_s13 = sphi %s639_s13, %s874_s13   ;;  %s603_s12 = sphi %s637_s12, %s873_s12   ;;  %s599_s11 = sphi %s635_s11, %s872_s11   ;;  %s595_s10 = sphi %s633_s10, %s871_s10   ;;  %s591_s9 = sphi %s631_s9, %s870_s9  }
   0x9   : > { %s33_s17 = sadd.s32 1, %s607_s13  ;;  %s42_s18 = sadd.s32 1, %s599_s11 }
   0xa   : > { %p35_p0 = scmp.ge.s32.totalorder %s33_s17, 2  ;;  %p49_p1 = scmp.ne.s32.totalorder %s599_s11, %s595_s10 }
   0xb   : > { %p50_p2 = scmp.eq.s32.totalorder %s611_s14, 0  ;;  %p55_p3 = scmp.ne.s32.totalorder %s595_s10, %s591_s9 }
   0xc   : > { %s876_s17 = smov (%p35_p0, %s33_s17), 0  ;;  %p56_p5 = scmp.eq.s32.totalorder %s378_s15, 0 }
   0xd   : > { %p672_p4 = por %p50_p2, %p49_p1  ;;  %s37_s20 = ssub.s32 %s607_s13, %s876_s17 }
   0xe   : > { %p109_p6 = scmp.eq.s32.totalorder %s378_s15, 1  ;;  %p40_p7 = scmp.eq.s32.totalorder %s37_s20, 0 }
   0xf   : > { %p678_p8 = por %p56_p5, %p55_p3  ;;  %p115_p10 = scmp.eq.s32.totalorder %s379_s16, 1 }
  0x10   : > { %p682_p9 = por %p109_p6, %p49_p1  ;;  %p411_p13 = scmp.lt.s32.totalorder %s611_s14, 2 }
  0x11   : > { %s858_s21 = scalar_select %p678_p8, 1, 0 }
  0x12   : > { %s859_s22 = scalar_select %p682_p9, 1, 0 }
  0x13   : > { %s687_s23 = scalar_select %p40_p7, %s599_s11, %s42_s18  }
  0x14   : > { %p689_p11 = por %p115_p10, %p55_p3  ;;  %s696_s25 = sand.u32 1, %s599_s11  }
  0x15   : > { %s382_s26 = sshll.u32 %s696_s25, 1  ;;  %s383_s27 = sshll.u32 %s607_s13, 5 }
  0x16   : > { %s860_s24 = scalar_select %p689_p11, 1, 0 }
  0x17   : > { %s703_s30 = scalar_lea.hbm %s852_s0, %s383_s27  ;;  %s139_s3 = scalar_lea.vmem [#allocation2], %s382_s26 }
  0x18   : > { %s147_s4 = sshll.u32 %s139_s3, 4  ;;  %p709_p0 = pnand %p411_p13, %p672_p4  ;;  %s705_s4 = int_to_ptr.vmem [resolvable:$true] %s147_s4 }
  0x19   : > { %s136_s6 = scalar_lea.sflag [#allocation3], %s696_s25  ;;  %s465_s7 = scalar_lea.hbm %s703_s30, 32 }
  0x1a   : > { %p466_p3 = scmp.ne.s32.totalorder %s703_s30, %s465_s7  ;;  %p467_p5 = pneg %p709_p0 }
  0x1b   : > { %s470_s16 = scalar_lea.hbm %s852_s0, 64  ;;  %p471_p4 = scmp.lt.u32.totalorder %s703_s30, %s852_s0 }
  0x1c   : > { %p468_p6 = pnand %p467_p5, %p466_p3  ;;  %p472_p10 = scmp.lt.u32.totalorder %s470_s16, %s465_s7 }
  0x1d   : > { %p474_p12 = scmp.lt.u32.totalorder %s465_s7, %s703_s30 }
  0x1e   : > { %p469_p7 = pneg %p468_p6  ;;  %p473_p13 = por %p472_p10, %p471_p4 }
  0x20   : > { %p475_p1 = por %p474_p12, %p473_p13 }
  0x22   : > { %p476_p2 = pnand %p475_p1, %p469_p7 }
  0x24   : > { %479 = shalt.err (!%p476_p2)
}
  0x25   : > { %s480_s20 = scalar_lea.vmem %s705_s4, 32  ;;  %s613_s26 = smov [#allocation2]  }
  0x26   : > { %p481_p3 = scmp.ne.s32.totalorder %s705_s4, %s480_s20  ;;  %s485_s27 = sshll.u32 %s613_s26, 4  ;;  %s486_s27 = int_to_ptr.vmem [resolvable:$false] %s485_s27 }
  0x27   : > { %s487_s28 = scalar_lea.vmem %s486_s27, 64  ;;  %p488_p9 = scmp.lt.s32.totalorder %s705_s4, %s486_s27 }
  0x28   : > { %p483_p6 = pnand %p481_p3, %p467_p5  ;;  %p489_p4 = scmp.lt.s32.totalorder %s487_s28, %s480_s20 }
  0x2a   : > { %p484_p11 = pneg %p483_p6  ;;  %p490_p10 = por %p489_p4, %p488_p9 }
  0x2c   : > { %p491_p12 = pnand %p490_p10, %p484_p11 }
  0x2e   : > { %494 = shalt.err (!%p491_p12)
}
  0x2f   : > { %403 = dma.hbm_to_vmem [thread:$0]  (!%p709_p0), %s703_s30, 32, %s705_s4, %s136_s6  }
  0x30   : > { %p862_p1 = scmp.lt.s32.totalorder %s611_s14, 3  ;;  %p863_p2 = scmp.ge.s32.totalorder %s611_s14, 1 }
  0x31   : > { %s384_s3 = sshll.u32 %s696_s25, 3  ;;  %s385_s7 = sshll.u32 %s607_s13, 7 }
  0x32   : > { %p745_p7 = pnand %p863_p2, %p862_p1  ;;  %s754_s16 = scalar_lea.hbm %s853_s1, %s385_s7 }
  0x33   : > { %s158_s18 = scalar_lea.vmem [#allocation5], %s384_s3  ;;  %s155_s30 = scalar_lea.sflag [#allocation6], %s696_s25 }
  0x34   : > { %s864_s29 = scalar_select %p745_p7, 1, 0 }
  0x35   : > { %s166_s19 = sshll.u32 %s158_s18, 4  ;;  %s495_s4 = scalar_lea.hbm %s754_s16, 128  ;;  %s167_s19 = int_to_ptr.vmem [resolvable:$true] %s166_s19 }
  0x36   : > { %p496_p9 = scmp.ne.s32.totalorder %s754_s16, %s495_s4  ;;  %s500_s26 = scalar_lea.hbm %s853_s1, 256 }
  0x37   : > { %p501_p3 = scmp.lt.u32.totalorder %s754_s16, %s853_s1  ;;  %p502_p6 = scmp.lt.u32.totalorder %s500_s26, %s495_s4 }
  0x38   : > { %p498_p11 = pnand %p496_p9, %p467_p5  ;;  %p504_p10 = scmp.lt.u32.totalorder %s495_s4, %s754_s16 }
  0x39   : > { %p503_p4 = por %p502_p6, %p501_p3 }
  0x3a   : > { %p499_p13 = pneg %p498_p11 }
  0x3b   : > { %p505_p12 = por %p504_p10, %p503_p4 }
  0x3d   : > { %p506_p1 = pnand %p505_p12, %p499_p13 }
  0x3f   : > { %509 = shalt.err (!%p506_p1)
}
  0x40   : > { %s510_s25 = scalar_lea.vmem %s167_s19, 128  ;;  %s614_s3 = smov [#allocation5]  }
  0x41   : > { %p511_p2 = scmp.ne.s32.totalorder %s167_s19, %s510_s25  ;;  %s515_s7 = sshll.u32 %s614_s3, 4  ;;  %s516_s7 = int_to_ptr.vmem [resolvable:$false] %s515_s7 }
  0x42   : > { %s517_s8 = scalar_lea.vmem %s516_s7, 256  ;;  %p518_p8 = scmp.lt.s32.totalorder %s167_s19, %s516_s7 }
  0x43   : > { %p513_p9 = pnand %p511_p2, %p467_p5  ;;  %p519_p7 = scmp.lt.s32.totalorder %s517_s8, %s510_s25 }
  0x45   : > { %p514_p11 = pneg %p513_p9  ;;  %p520_p3 = por %p519_p7, %p518_p8 }
  0x47   : > { %p521_p6 = pnand %p520_p3, %p514_p11 }
  0x49   : > { %524 = shalt.err (!%p521_p6)
}
  0x4a   : > { %406 = dma.hbm_to_vmem [thread:$0]  (!%p709_p0), %s754_s16, 128, %s167_s19, %s155_s30  }
  0x4b   : > { %p865_p13 = scmp.ne.s32.totalorder %s864_s29, 0 }
  0x4c   : > { %s779_s15 = sand.u32 (!%p865_p13), 1, %s595_s10   ;;  %p866_p8 = scmp.ne.s32.totalorder (!%p865_p13), %s858_s21, 0 }
  0x4d   : > { %175 = sbr.rel (%p865_p13) target bundleno = 262 (0x106), region = 28  ;;  %s387_s18 = sshll.u32 (!%p865_p13), %s779_s15, 1 }
  0x4e   : > { %s178_s4 = scalar_lea.sflag (!%p865_p13), [#allocation3], %s779_s15  ;;  %s181_s6 = scalar_lea.vmem (!%p865_p13), [#allocation2], %s387_s18 }
  0x54   : > { %578 = dma.done.wait (%p866_p8), %s178_s4, 32  }
  0x55   : > { %580 = vsyncadd (%p866_p8), %s178_s4, 4294967264  ;;  %s388_s5 = sshll.u32 %s779_s15, 3  ;;  %s187_s29 = scalar_lea.sflag [#allocation6], %s779_s15 }
  0x56   : > { %s190_s16 = scalar_lea.vmem [#allocation5], %s388_s5 }
  0x57   : > { %582 = dma.done.wait (%p866_p8), %s187_s29, 128  }
  0x58   : > { %584 = vsyncadd (%p866_p8), %s187_s29, 4294967168  ;;  %vm218_vm0 = vcmask 64512   ;;  %v217_v0 = vld [vmem:[%s190_s16] sm:$0xff]  ;;  %v216_v2 = vld [vmem:[%s181_s6] sm:$0x3]  ;;  %vm223_vm1 = vcmask 58368   ;;  %v240_v16 = vlaneseq }
  0x59   : > { %v219_v1 = vsel %vm218_vm0, %v217_v0, 0.0  ;;  %v222_v3 = vmul.f32 %v216_v2, %v216_v2  ;;  %s391_s21 = sshll.u32 %s603_s12, 5  ;;  %s215_s19 = scalar_lea.vmem [#allocation7], %s387_s18 }
  0x5a   : > { %220 = vadd.xlane.f32.xlu0 %v219_v1  ;;  %v241_v18 = vand.u32 127, %v240_v16  ;;  %v243_v19 = vshrl.u32 %v240_v16, 7  ;;  %s274_s30 = sshll.u32 %s215_s19, 4  ;;  %s802_s27 = scalar_lea.hbm %s854_s2, %s391_s21  ;;  %s804_s30 = int_to_ptr.vmem [resolvable:$true] %s274_s30 }
  0x5b   : > { %v224_v4 = vsel %vm223_vm1, %v222_v3, 0.0  ;;  %s260_s28 = scalar_lea.sflag [#allocation4], %s779_s15  ;;  %s525_s25 = scalar_lea.vmem %s804_s30, 32 }
  0x5c   : > { %v225_v5 = vrot.slane %v224_v4, 4  ;;  %v244_v20 = vsub.s32 %v241_v18, %v243_v19  ;;  %v255_v28 = vsub.s32 0, %v243_v19  ;;  %p526_p0 = scmp.ne.s32.totalorder %s804_s30, %s525_s25  ;;  %p867_p5 = scmp.ne.s32.totalorder %s859_s22, 0 }
  0x5d   : > { %s615_s12 = smov [#allocation7]  }
  0x5e   : > { %v226_v6 = vadd.f32 %v225_v5, %v224_v4  ;;  %p527_p7 = pnand %p526_p0, %p867_p5  ;;  %s529_s3 = sshll.u32 %s615_s12, 4  ;;  %s530_s3 = int_to_ptr.vmem [resolvable:$false] %s529_s3 }
  0x5f   : > { %s531_s7 = scalar_lea.vmem %s530_s3, 64  ;;  %p532_p10 = scmp.lt.s32.totalorder %s804_s30, %s530_s3 }
  0x60   : > { %v227_v7 = vrot.slane %v226_v6, 2  ;;  %p528_p4 = pneg %p527_p7  ;;  %p533_p12 = scmp.lt.s32.totalorder %s531_s7, %s525_s25 }
  0x62   : > { %v228_v8 = vadd.f32 %v227_v7, %v226_v6  ;;  %p534_p1 = por %p533_p12, %p532_p10 }
  0x64   : > { %v229_v9 = vrot.slane %v228_v8, 1  ;;  %p535_p2 = pnand %p534_p1, %p528_p4 }
  0x66   : > { %v230_v10 = vadd.f32 %v229_v9, %v228_v8 }
  0x68   : > { %461 = vrsqrt.f32 %v230_v10  ;;  %vm233_vm2 = vcmp.eq.f32.partialorder %v230_v10, inf  ;;  %v236_v13 = vand.u32 2147483648, %v230_v10  ;;  %vm235_vm3 = vcmp.eq.f32.partialorder %v230_v10, 0.0 }
  0x72   : > { %v462_v11 = vpop.eup %461 }
  0x73   : > { %v232_v12 = vmul.f32 %v462_v11, %v230_v10 }
  0x75   : > { %v234_v14 = vsel %vm233_vm2, %v230_v10, %v232_v12 }
  0x76   : > { %v237_v15 = vsel %vm235_vm3, %v236_v13, %v234_v14 }
  0x77   : > { %v250_v17 = vadd.f32 1e-08, %v237_v15 }
  0x79   : > { %463 = vrcp.f32 %v250_v17 }
  0x83   : > { %v464_v26 = vpop.eup %463 }
  0xe7   : > { %v221_v21 = vpop.xlane.xlu0 %220 }
  0xe8   : > { %v238_v22 = vmul.f32 0.1, %v221_v21 }
  0xea   : > { %v245_v23 = vrot.slane %v238_v22, %v244_v20 }
  0xec   : > { %v247_v24 = vadd.f32 %v245_v23, %v237_v15 }
  0xee   : > { %v248_v25 = vmax.f32 %v247_v24, 0.5 }
  0xf0   : > { %v249_v27 = vmin.f32 %v248_v25, 2.0 }
  0xf2   : > { %v252_v29 = vmul.f32 %v464_v26, %v249_v27 }
  0xf4   : > { %v256_v30 = vrot.slane %v252_v29, %v255_v28 }
  0xf6   : > { %v257_v31 = vmul.f32 %v256_v30, %v216_v2 }
  0xf8   : > { %258 = vst.msk [vmem:[%s215_s19] sm:$0x3] %vm223_vm1, %v257_v31 }
  0xf9   : > { %538 = shalt.err (!%p535_p2)
}
  0xfa   : > { %s539_s8 = scalar_lea.hbm %s802_s27, 32  ;;  %s543_s4 = scalar_lea.hbm %s854_s2, 64 }
  0xfb   : > { %p540_p9 = scmp.ne.s32.totalorder %s802_s27, %s539_s8  ;;  %p544_p6 = scmp.lt.u32.totalorder %s802_s27, %s854_s2 }
  0xfc   : > { %p545_p13 = scmp.lt.u32.totalorder %s543_s4, %s539_s8  ;;  %p547_p0 = scmp.lt.u32.totalorder %s539_s8, %s802_s27 }
  0xfd   : > { %p541_p11 = pnand %p540_p9, %p867_p5 }
  0xfe   : > { %p546_p8 = por %p545_p13, %p544_p6 }
  0xff   : > { %p542_p3 = pneg %p541_p11 }
 0x100   : > { %p548_p7 = por %p547_p0, %p546_p8 }
 0x102   : > { %p549_p4 = pnand %p548_p7, %p542_p3 }
 0x104   : > { %552 = shalt.err (!%p549_p4)
}
 0x105   : > { %398 = dma.vmem_to_hbm [thread:$0]  (%p867_p5), %s804_s30, 32, %s802_s27, %s260_s28  }
 0x106 PF: > { %s286_s29 = sand.u32 1, %s591_s9   ;;  %p868_p10 = scmp.ne.s32.totalorder %s860_s24, 0 }
 0x107   : > { %p869_p12 = scmp.ge.s32.totalorder %s611_s14, 2  ;;  %s287_s16 = scalar_lea.sflag [#allocation4], %s286_s29 }
 0x109   : > { %p408_p1 = pnand %p869_p12, %p868_p10 }
 0x10b   : > { %586 = dma.done.wait (!%p408_p1), %s287_s16, 32  }
 0x10c   : > { %588 = vsyncadd (!%p408_p1), %s287_s16, 4294967264  ;;  %s21_s14 = sadd.s32 1, %s611_s14   ;;  %s870_s9 = smov %s595_s10 }
 0x10d   : > { %p18_p2 = scmp.ge.s32.totalorder %s21_s14, 4   ;;  %s871_s10 = smov %s599_s11 }
 0x10e   : > { %s872_s11 = smov %s687_s23  ;;  %s873_s12 = smov %s607_s13 }
 0x10f   : > { %s874_s13 = smov %s876_s17  ;;  %20 = sbr.rel (!%p18_p2) target bundleno = 8 (0x8), region = 86 }
 0x116   :  { %292 = vsyncpa [#allocation3], 1 }
 0x117   :  { %294 = vsyncpa [#allocation3 + $0x1], 1 }
 0x118   :  { %295 = vsyncpa [#allocation6], 1 }
 0x119   :  { %297 = vsyncpa [#allocation6 + $0x1], 1 }
 0x11a   :  { %298 = vsyncpa [#allocation4], 1 }
 0x11b   :  { %300 = vsyncpa [#allocation4 + $0x1], 1 }

</bundles_post_ra>
